<compile_context>
chip_gen: v5e
topology: v5e:2x2
jax: 0.10.0
libtpu: 0.0.40
codegen_flags: <defaults>
</compile_context>

<pallas_src>
import functools

import jax
import jax.numpy as jnp
from jax.experimental import pallas as pl
from jax.experimental.pallas import tpu as pltpu


def _layernorm_kernel(x_ref, gamma_ref, beta_ref, out_ref, *, eps, feat):
    # x_ref:     (TOK, D) tile of independent rows.  The last grid block may
    #            extend past N: those padded rows produce garbage locally but
    #            never affect valid rows (no cross-row reduction) and their
    #            writes are masked by Pallas -- intentionally left unhandled.
    # gamma_ref: (1, D) f32 scale (a2), same block every step -> VMEM resident
    # beta_ref:  (1, D) f32 shift (b2)
    # out_ref:   (TOK, D) output tile in x.dtype
    x = x_ref[...].astype(jnp.float32)                          # (TOK, D)

    # One-pass moments in f32: two independent lane reductions, no dependent
    # second sweep over a centered (TOK, D) intermediate.
    sum_x = jnp.sum(x, axis=-1, keepdims=True)                  # (TOK, 1)
    sum_xx = jnp.sum(x * x, axis=-1, keepdims=True)             # (TOK, 1)
    mean = sum_x * (1.0 / feat)
    denom = max(feat - 1, 1)                                    # torch.std: unbiased
    var = jnp.maximum(sum_xx - sum_x * mean, 0.0) * (1.0 / denom)
    std = jnp.sqrt(var)
    inv = 1.0 / (std + eps)                                     # eps added to std

    # y = gamma * (x - mean) * inv + beta, with (1,D)*(TOK,1) broadcast of the
    # per-row scale so only 4 full-tile VPU ops touch the (TOK, D) data.
    y = (x - mean) * (gamma_ref[...] * inv) + beta_ref[...]
    out_ref[...] = y.astype(out_ref.dtype)


def layernorm_forward(x, gamma, beta, *, eps=1e-6,
                      target_block_bytes=2 * 1024 * 1024):
    """LayerNorm over the last dim of x.

    x:     (..., D)
    gamma: (D,)  -- a2 (kept in f32)
    beta:  (D,)  -- b2 (kept in f32)
    """
    orig_shape = x.shape
    D = orig_shape[-1]
    x2 = x.reshape(-1, D)
    N = x2.shape[0]

    def _round_up(a, b):
        return (a + b - 1) // b * b

    # Row block from a VMEM byte budget: ~2 MiB of f32 working set per block.
    # Multiple of 8 sublanes; never larger than the (rounded-up) row count.
    tok = max(8, (target_block_bytes // (D * 4)) // 8 * 8)
    tok = min(tok, _round_up(N, 8))
    # v7x megacore: guarantee >= 2 grid steps so the "parallel" axis can be
    # sharded across both TensorCores instead of collapsing to a 1-step grid.
    if N > 8 and pl.cdiv(N, tok) < 2:
        tok = max(8, _round_up(pl.cdiv(N, 2), 8))

    gamma2 = gamma.reshape(1, D).astype(jnp.float32)
    beta2 = beta.reshape(1, D).astype(jnp.float32)

    kernel = functools.partial(_layernorm_kernel, eps=eps, feat=D)

    out = pl.pallas_call(
        kernel,
        out_shape=jax.ShapeDtypeStruct((N, D), x.dtype),
        grid_spec=pltpu.PrefetchScalarGridSpec(
            num_scalar_prefetch=0,
            # No host-side padding: Pallas masks the ragged last block.
            grid=(pl.cdiv(N, tok),),
            in_specs=[
                # (TOK, D): last dim equals the full array dim, rows a multiple
                # of 8 -> legal, lane/sublane-dense tiles.
                pl.BlockSpec((tok, D), lambda i: (i, 0)),
                pl.BlockSpec((1, D), lambda i: (0, 0)),   # gamma (same block every step)
                pl.BlockSpec((1, D), lambda i: (0, 0)),   # beta
            ],
            out_specs=pl.BlockSpec((tok, D), lambda i: (i, 0)),
        ),
        compiler_params=pltpu.CompilerParams(
            # Row blocks are fully independent -> shard across TCs.
            dimension_semantics=("parallel",),
            # Explicit scoped-VMEM budget: generous vs. the ~2 MiB/block tiles,
            # but safe on v5e (16 MiB default), v6e and v7x (32 MiB default).
            vmem_limit_bytes=32 * 1024 * 1024,
        ),
    )(x2, gamma2, beta2)

    return out.reshape(orig_shape)


if __name__ == "__main__":
    # Small shapes consistent with the module: (batch, seq, hidden).
    batch, seq, hidden = 2, 8, 32
    eps = 1e-6

    key = jax.random.PRNGKey(0)
    kx, kg, kb = jax.random.split(key, 3)

    x = jax.random.normal(kx, (batch, seq, hidden), dtype=jnp.float32)
    # a2 / b2 are learnable parameters (init ones/zeros); use non-trivial
    # values here so the scale/shift path is actually exercised.
    gamma = 1.0 + 0.1 * jax.random.normal(kg, (hidden,), dtype=jnp.float32)
    beta = 0.1 * jax.random.normal(kb, (hidden,), dtype=jnp.float32)

    out = layernorm_forward(x, gamma, beta, eps=eps)
    out = jax.block_until_ready(out)

    # Pure-JAX reference matching the PyTorch module exactly:
    #   unbiased std (ddof=1), eps added to std (not variance).
    mean = x.mean(-1, keepdims=True)
    std = jnp.std(x, axis=-1, keepdims=True, ddof=1)
    ref = gamma * (x - mean) / (std + eps) + beta

    assert out.shape == x.shape
    assert jnp.allclose(out, ref, atol=3e-5, rtol=3e-5)

    print("KERNEL_OK")
</pallas_src>

<mosaic_0001>
module attributes {stable_mosaic.version = 11 : i64} {
  func.func @_layernorm_kernel(%arg0: i32, %arg1: memref<8x32xf32, #tpu.memory_space<vmem>>, %arg2: memref<1x32xf32, #tpu.memory_space<vmem>>, %arg3: memref<1x32xf32, #tpu.memory_space<vmem>>, %arg4: memref<8x32xf32, #tpu.memory_space<vmem>>) attributes {dimension_semantics = [#tpu.dimension_semantics<parallel>], iteration_bounds = array<i64: 2>, scalar_prefetch = 0 : i64, scratch_operands = 0 : i64, tpu.core_type = #tpu.core_type<tc>, window_params = [{transform_indices = @transform_0, window_bounds = array<i64: 8, 32>}, {pipeline_mode = #tpu.pipeline_mode<synchronous>, transform_indices = @transform_1, window_bounds = array<i64: 1, 32>}, {pipeline_mode = #tpu.pipeline_mode<synchronous>, transform_indices = @transform_2, window_bounds = array<i64: 1, 32>}, {transform_indices = @transform_3, window_bounds = array<i64: 8, 32>}]} {
    %c0 = arith.constant 0 : index
    %c0_0 = arith.constant 0 : index
    %0 = vector.load %arg1[%c0, %c0_0] : memref<8x32xf32, #tpu.memory_space<vmem>>, vector<8x32xf32>
    %cst = arith.constant dense<0.000000e+00> : vector<8xf32>
    %1 = vector.multi_reduction <add>, %0, %cst [1] : vector<8x32xf32> to vector<8xf32>
    %2 = vector.shape_cast %1 : vector<8xf32> to vector<8x1xf32>
    %3 = arith.mulf %0, %0 : vector<8x32xf32>
    %cst_1 = arith.constant dense<0.000000e+00> : vector<8xf32>
    %4 = vector.multi_reduction <add>, %3, %cst_1 [1] : vector<8x32xf32> to vector<8xf32>
    %5 = vector.shape_cast %4 : vector<8xf32> to vector<8x1xf32>
    %cst_2 = arith.constant 3.125000e-02 : f32
    %6 = vector.broadcast %cst_2 : f32 to vector<8x1xf32>
    %7 = arith.mulf %2, %6 : vector<8x1xf32>
    %8 = arith.mulf %2, %7 : vector<8x1xf32>
    %9 = arith.subf %5, %8 : vector<8x1xf32>
    %cst_3 = arith.constant 0.000000e+00 : f32
    %10 = vector.broadcast %cst_3 : f32 to vector<8x1xf32>
    %11 = arith.maximumf %9, %10 : vector<8x1xf32>
    %cst_4 = arith.constant 0.0322580636 : f32
    %12 = vector.broadcast %cst_4 : f32 to vector<8x1xf32>
    %13 = arith.mulf %11, %12 : vector<8x1xf32>
    %14 = math.sqrt %13 : vector<8x1xf32>
    %cst_5 = arith.constant 9.99999997E-7 : f32
    %15 = vector.broadcast %cst_5 : f32 to vector<8x1xf32>
    %16 = arith.addf %14, %15 : vector<8x1xf32>
    %cst_6 = arith.constant 1.000000e+00 : f32
    %17 = vector.broadcast %cst_6 : f32 to vector<8x1xf32>
    %18 = arith.divf %17, %16 : vector<8x1xf32>
    %19 = vector.broadcast %7 : vector<8x1xf32> to vector<8x32xf32>
    %20 = arith.subf %0, %19 : vector<8x32xf32>
    %c0_7 = arith.constant 0 : index
    %c0_8 = arith.constant 0 : index
    %21 = vector.load %arg2[%c0_7, %c0_8] : memref<1x32xf32, #tpu.memory_space<vmem>>, vector<1x32xf32>
    %22 = vector.broadcast %21 : vector<1x32xf32> to vector<8x32xf32>
    %23 = vector.broadcast %18 : vector<8x1xf32> to vector<8x32xf32>
    %24 = arith.mulf %22, %23 : vector<8x32xf32>
    %25 = arith.mulf %20, %24 : vector<8x32xf32>
    %c0_9 = arith.constant 0 : index
    %c0_10 = arith.constant 0 : index
    %26 = vector.load %arg3[%c0_9, %c0_10] : memref<1x32xf32, #tpu.memory_space<vmem>>, vector<1x32xf32>
    %27 = vector.broadcast %26 : vector<1x32xf32> to vector<8x32xf32>
    %28 = arith.addf %25, %27 : vector<8x32xf32>
    %c0_11 = arith.constant 0 : index
    %c0_12 = arith.constant 0 : index
    %29 = vector.load %arg4[%c0_11, %c0_12] : memref<8x32xf32, #tpu.memory_space<vmem>>, vector<8x32xf32>
    tpu.vector_store %arg4[%c0_11, %c0_12], %28 {strides = array<i32>} : memref<8x32xf32, #tpu.memory_space<vmem>>, vector<8x32xf32>,
    return
  }
  func.func @transform_0(%arg0: i32) -> (i32, i32) {
    %c0_i32 = arith.constant 0 : i32
    %c0_i32_0 = arith.constant 0 : i32
    return %arg0, %c0_i32 : i32, i32
  }
  func.func @transform_1(%arg0: i32) -> (i32, i32) {
    %c0_i32 = arith.constant 0 : i32
    %c0_i32_0 = arith.constant 0 : i32
    %c0_i32_1 = arith.constant 0 : i32
    return %c0_i32, %c0_i32_0 : i32, i32
  }
  func.func @transform_2(%arg0: i32) -> (i32, i32) {
    %c0_i32 = arith.constant 0 : i32
    %c0_i32_0 = arith.constant 0 : i32
    %c0_i32_1 = arith.constant 0 : i32
    return %c0_i32, %c0_i32_0 : i32, i32
  }
  func.func @transform_3(%arg0: i32) -> (i32, i32) {
    %c0_i32 = arith.constant 0 : i32
    %c0_i32_0 = arith.constant 0 : i32
    return %arg0, %c0_i32 : i32, i32
  }
}

</mosaic_0001>

<bundles_post_ra>
// kernel: tpu_custom_call.1
= control target key start
LH: loop header
LB: loop body
LE: loop exit
PB: predicated region body
PF: predicated region fallthrough
CT: control target
= control target key end

     0   :  { %8 = vsyncpa [#allocation3], 0  ;;  %s732_s0 = inlined_call_operand.hbm [shape: f32[16,32], index: 0, kind: input, shape index: {}]   ;;  %s733_s1 = inlined_call_operand.hbm [shape: f32[1,32], index: 1, kind: input, shape index: {}]   ;;  %s734_s2 = inlined_call_operand.vmem [shape: f32[1,32], index: 2, kind: input, shape index: {}]   ;;  %s735_s3 = inlined_call_operand.hbm [shape: f32[16,32], index: 3, kind: output, shape index: {}]  }
   0x1   :  { %10 = vsyncpa [#allocation3 + $0x1], 0 }
   0x2   :  { %11 = vsyncpa [#allocation6], 0 }
   0x3   :  { %12 = vsyncpa [#allocation4], 0 }
   0x4   :  { %14 = vsyncpa [#allocation4 + $0x1], 0  ;;  %s584_s12 = smov 0   ;;  %s586_s13 = smov 0  }
   0x5   :  { %s588_s14 = smov 0   ;;  %s590_s15 = smov 0  }
   0x6 LB: > { %s605_s16 = sadd.s32 4294967295, %s561_s15   ;;  %s354_s17 = sadd.s32 4294967294, %s561_s15   ;;  %s561_s15 = sphi %s590_s15, %s745_s15   ;;  %s557_s14 = sphi %s588_s14, %s744_s14   ;;  %s553_s13 = sphi %s586_s13, %s743_s13   ;;  %s549_s12 = sphi %s584_s12, %s742_s12  }
   0x7   : > { %p40_p0 = scmp.ne.s32.totalorder %s553_s13, %s549_s12  ;;  %p41_p1 = scmp.eq.s32.totalorder %s605_s16, 0 }
   0x8   : > { %p106_p2 = scmp.eq.s32.totalorder %s605_s16, 1  ;;  %p112_p3 = scmp.eq.s32.totalorder %s354_s17, 1 }
   0x9   : > { %p614_p4 = por %p41_p1, %p40_p0  ;;  %p355_p5 = scmp.ge.s32.totalorder %s561_s15, 1 }
   0xa   : > { %p619_p6 = por %p112_p3, %p40_p0  ;;  %p119_p7 = scmp.lt.s32.totalorder %s561_s15, 3 }
   0xb   : > { %s131_s22 = sshll.u32 %s733_s1, 4  ;;  %s563_s24 = smov [#allocation5]   ;;  %s132_s22 = int_to_ptr.hbm [resolvable:$true] %s131_s22 }
   0xc   : > { %p627_p8 = pnand %p355_p5, %p119_p7  ;;  %s133_s25 = sshll.u32 %s563_s24, 4  ;;  %s134_s25 = int_to_ptr.vmem [resolvable:$true] %s133_s25 }
   0xd   : > { %s637_s26 = sadd.s32 1, %s561_s15   ;;  %s27_s27 = sadd.s32 1, %s557_s14 }
   0xe   : > { %p376_p10 = pneg %p627_p8  ;;  %s24_s28 = ssub.s32 %s561_s15, %s637_s26 }
   0xf   : > { %p25_p12 = scmp.eq.s32.totalorder %s24_s28, 0  ;;  %p34_p13 = scmp.ne.s32.totalorder %s557_s14, %s553_s13 }
  0x10   : > { %p377_p11 = pnand %p376_p10, %p41_p1  ;;  %p35_p0 = scmp.eq.s32.totalorder %s561_s15, 0 }
  0x11   : > { %s646_s29 = scalar_select %p25_p12, %s557_s14, %s27_s27  }
  0x12   : > { %379 = dma.hbm_to_vmem [thread:$0]  (!%p377_p11), %s132_s22, 16, %s134_s25, [#allocation6]  }
  0x13   : > { %p650_p3 = por %p106_p2, %p34_p13  ;;  %p389_p5 = scmp.lt.s32.totalorder %s561_s15, 2 }
  0x14   : > { %s147_s4 = sand.u32 1, %s557_s14   ;;  %s359_s5 = sshll.u32 %s561_s15, 3 }
  0x15   : > { %p36_p7 = por %p35_p0, %p34_p13  ;;  %s358_s6 = sshll.u32 %s147_s4, 3 }
  0x16   : > { %s155_s9 = scalar_lea.hbm %s732_s0, %s359_s5  ;;  %s151_s11 = scalar_lea.vmem [#allocation2], %s358_s6 }
  0x17   : > { %s157_s10 = sshll.u32 %s155_s9, 4  ;;  %s159_s17 = sshll.u32 %s151_s11, 4  ;;  %s158_s10 = int_to_ptr.hbm [resolvable:$true] %s157_s10  ;;  %s160_s17 = int_to_ptr.vmem [resolvable:$true] %s159_s17 }
  0x18   : > { %p660_p10 = pnand %p389_p5, %p36_p7  ;;  %s148_s21 = scalar_lea.sflag [#allocation3], %s147_s4 }
  0x19   : > { %s461_s22 = sshra.s32 %s158_s10, 4  ;;  %s468_s28 = scalar_lea.hbm %s732_s0, 16  ;;  %s462_s22 = int_to_ptr.hbm [resolvable:$true] %s461_s22 }
  0x1a   : > { %s463_s24 = scalar_lea.hbm %s462_s22, 8  ;;  %p465_p11 = pneg %p660_p10 }
  0x1b   : > { %p464_p2 = scmp.ne.s32.totalorder %s462_s22, %s463_s24  ;;  %p469_p0 = scmp.lt.s32.totalorder %s462_s22, %s732_s0 }
  0x1c   : > { %p470_p5 = scmp.lt.s32.totalorder %s468_s28, %s463_s24 }
  0x1d   : > { %p466_p12 = pnand %p465_p11, %p464_p2 }
  0x1e   : > { %p471_p7 = por %p470_p5, %p469_p0 }
  0x1f   : > { %p467_p13 = pneg %p466_p12 }
  0x21   : > { %p472_p9 = pnand %p471_p7, %p467_p13 }
  0x23   : > { %475 = shalt.err (!%p472_p9)
}
  0x24   : > { %383 = dma.hbm_to_vmem [thread:$0]  (!%p660_p10), %s158_s10, 128, %s160_s17, %s148_s21  }
  0x25   : > { %168 = sbr.rel (%p627_p8) target bundleno = 226 (0xe2), region = 32  ;;  %s677_s4 = sand.u32 (!%p627_p8), 1, %s553_s13  }
  0x26   : > { %s361_s7 = sshll.u32 (!%p627_p8), %s677_s4, 3  ;;  %s171_s8 = scalar_lea.sflag (!%p627_p8), [#allocation3], %s677_s4 }
  0x27   : > { %s174_s9 = scalar_lea.vmem (!%p627_p8), [#allocation2], %s361_s7 }
  0x2a   : > { %536 = dma.done.wait (%p614_p4), %s171_s8, 128  }
  0x2b   : > { %538 = vsyncadd (%p614_p4), %s171_s8, 4294967168 }
  0x2c   : > { %540 = dma.done.wait (%p41_p1), [#allocation6], 16  }
  0x2d   : > { %542 = vsyncadd (%p41_p1), [#allocation6], 4294967280  ;;  %vm204_vm0 = vcmask 261120   ;;  %v203_v0 = vld [vmem:[%s174_s9] sm:$0xff]  ;;  %s365_s18 = sshll.u32 %s605_s16, 3  ;;  %s202_s16 = scalar_lea.vmem [#allocation7], %s361_s7 }
  0x2e   : > { %v205_v1 = vsel %vm204_vm0, %v203_v0, 0.0  ;;  %v208_v2 = vmul.f32 %v203_v0, %v203_v0  ;;  %v425_v29 = vld [vmem:[#allocation5] ss:$0 sm:$0xff]  ;;  %s269_s11 = scalar_lea.hbm %s735_s3, %s365_s18  ;;  %v426_v35 = vld [vmem:[%s734_s2] ss:$0 sm:$0xff]  ;;  %s271_s21 = sshll.u32 %s202_s16, 4  ;;  %s272_s21 = int_to_ptr.vmem [resolvable:$true] %s271_s21 }
  0x2f   : > { %206 = vadd.xlane.f32.xlu0 %v205_v1  ;;  %s273_s22 = sshll.u32 %s269_s11, 4  ;;  %s259_s24 = scalar_lea.sflag [#allocation4], %s677_s4  ;;  %s274_s22 = int_to_ptr.hbm [resolvable:$true] %s273_s22 }
  0x30   : > { %v209_v3 = vsel %vm204_vm0, %v208_v2, 0.0  ;;  %s505_s25 = sshra.s32 %s274_s22, 4  ;;  %s511_s6 = scalar_lea.hbm %s735_s3, 16  ;;  %s506_s25 = int_to_ptr.hbm [resolvable:$true] %s505_s25 }
  0x31   : > { %s507_s27 = scalar_lea.hbm %s506_s25, 8  ;;  %p512_p9 = scmp.lt.s32.totalorder %s506_s25, %s735_s3 }
  0x32   : > { %p508_p1 = scmp.ne.s32.totalorder %s506_s25, %s507_s27  ;;  %p513_p10 = scmp.lt.s32.totalorder %s511_s6, %s507_s27 }
  0x34   : > { %p509_p4 = pnand %p508_p1, %p650_p3  ;;  %p514_p2 = por %p513_p10, %p512_p9 }
  0x36   : > { %p510_p8 = pneg %p509_p4 }
  0x37   : > { %210 = vadd.xlane.f32.xlu0 %v209_v3 }
  0x38   : > { %p515_p11 = pnand %p514_p2, %p510_p8 }
  0xa2   : > { %v207_v4 = vpop.xlane.xlu0 %206 }
  0xa3   : > { %v212_v5 = vmul.f32 0.03125, %v207_v4 }
  0xa5   : > { %v213_v6 = vmul.f32 %v212_v5, %v207_v4  ;;  %v245_v33 = vsub.f32 %v203_v0, %v212_v5 }
  0xaa   : > { %v211_v7 = vpop.xlane.xlu0 %210 }
  0xab   : > { %v214_v8 = vsub.f32 %v211_v7, %v213_v6 }
  0xad   : > { %v215_v9 = vmax.f32 %v214_v8, 0.0 }
  0xaf   : > { %v216_v10 = vmul.f32 0.032258064, %v215_v9 }
  0xb1   : > { %427 = vrsqrt.f32 %v216_v10  ;;  %vm224_vm1 = vcmp.eq.f32.partialorder %v216_v10, inf  ;;  %v227_v18 = vand.u32 2147483648, %v216_v10  ;;  %vm226_vm2 = vcmp.eq.f32.partialorder %v216_v10, 0.0 }
  0xb7   : > { %v428_v11 = vpop.eup %427 }
  0xb8   : > { %v218_v12 = vmul.f32 %v428_v11, %v216_v10 }
  0xba   : > { %v219_v13 = vmul.f32 %v428_v11, %v218_v12 }
  0xbc   : > { %v220_v14 = vmul.f32 0.5, %v219_v13 }
  0xbe   : > { %v221_v15 = vsub.f32 1.5, %v220_v14 }
  0xc0   : > { %v222_v16 = vmul.f32 %v428_v11, %v221_v15 }
  0xc2   : > { %v223_v17 = vmul.f32 %v222_v16, %v216_v10 }
  0xc4   : > { %v225_v19 = vsel %vm224_vm1, %v216_v10, %v223_v17 }
  0xc5   : > { %v228_v20 = vsel %vm226_vm2, %v227_v18, %v225_v19 }
  0xc6   : > { %v229_v21 = vadd.f32 1e-06, %v228_v20 }
  0xc8   : > { %429 = vrcp.f32 %v229_v21  ;;  %v241_v25 = vand.u32 2147483648, %v229_v21  ;;  %v239_v27 = vand.u32 2147483647, %v229_v21  ;;  %vm235_vm4 = vweird.f32 %v229_v21 }
  0xca   : > { %v242_v30 = vor.u32 1.1754944e-38, %v241_v25  ;;  %vm240_vm6 = vcmp.eq.f32.partialorder %v239_v27, 8.507059e+37 }
  0xce   : > { %v430_v22 = vpop.eup %429 }
  0xcf   : > { %v231_v23 = vmul.f32 %v430_v22, %v229_v21  ;;  %vm236_vm3 = vweird.f32 %v430_v22 }
  0xd0   : > { %vm237_vm5 = vmor %vm235_vm4, %vm236_vm3 }
  0xd1   : > { %v232_v24 = vsub.f32 1.0, %v231_v23 }
  0xd3   : > { %v233_v26 = vmul.f32 %v430_v22, %v232_v24 }
  0xd5   : > { %v234_v28 = vadd.f32 %v430_v22, %v233_v26 }
  0xd7   : > { %v238_v31 = vsel %vm237_vm5, %v430_v22, %v234_v28 }
  0xd8   : > { %v243_v32 = vsel %vm240_vm6, %v242_v30, %v238_v31 }
  0xd9   : > { %v250_v34 = vmul.f32 %v425_v29, %v243_v32 }
  0xdb   : > { %v251_v36 = vmul.f32 %v250_v34, %v245_v33 }
  0xdd   : > { %v256_v37 = vadd.f32 %v426_v35, %v251_v36 }
  0xdf   : > { %257 = vst.msk [vmem:[%s202_s16] sm:$0xff] %vm204_vm0, %v256_v37 }
  0xe0   : > { %518 = shalt.err (!%p515_p11)
}
  0xe1   : > { %374 = dma.vmem_to_hbm [thread:$0]  (%p650_p3), %s272_s21, 128, %s274_s22, %s259_s24  }
  0xe2 PF: > { %s285_s4 = sand.u32 1, %s549_s12   ;;  %p741_p12 = scmp.ge.s32.totalorder %s561_s15, 2 }
  0xe3   : > { %s286_s9 = scalar_lea.sflag [#allocation4], %s285_s4 }
  0xe4   : > { %p385_p13 = pnand %p741_p12, %p619_p6 }
  0xe6   : > { %p386_p0 = pneg %p385_p13 }
  0xe8   : > { %544 = dma.done.wait (%p386_p0), %s286_s9, 128  }
  0xe9   : > { %546 = vsyncadd (%p386_p0), %s286_s9, 4294967168  ;;  %p17_p5 = scmp.ge.s32.totalorder %s637_s26, 4   ;;  %s742_s12 = smov %s553_s13 }
  0xea   : > { %s743_s13 = smov %s557_s14  ;;  %s744_s14 = smov %s646_s29 }
  0xeb   : > { %s745_s15 = smov %s637_s26  ;;  %19 = sbr.rel (!%p17_p5) target bundleno = 6 (0x6), region = 81 }
  0xf0   :  { %292 = vsyncpa [#allocation3], 1 }
  0xf1   :  { %294 = vsyncpa [#allocation3 + $0x1], 1 }
  0xf2   :  { %295 = vsyncpa [#allocation6], 1 }
  0xf3   :  { %296 = vsyncpa [#allocation4], 1 }
  0xf4   :  { %298 = vsyncpa [#allocation4 + $0x1], 1 }

</bundles_post_ra>
